<compile_context>
chip_gen: v7x
topology: tpu7x:2x2x1
jax: 0.10.0
libtpu: 0.0.40
codegen_flags: <defaults>
</compile_context>

<pallas_src>
import jax
import jax.numpy as jnp
from jax.experimental import pallas as pl
from jax.experimental.pallas import tpu as pltpu  # noqa: F401  (TPU backend)

BN_EPS = 1e-5
HID = 64

# Packed parameter slab layout (all row offsets are multiples of 8).
ROW_W1 = 0     # fc1 weight (1, 64); rows 1..7 are alignment padding
ROW_G = 8      # BN gammas  g1,g2,g3,g4(padded to 64)  -> rows 8..11
ROW_BE = 12    # BN betas   be1,be2,be3,be4(padded)    -> rows 12..15
ROW_W2 = 16    # fc2 weight (64, 64)                   -> rows 16..79
ROW_W3 = 80    # fc3 weight (64, 64)                   -> rows 80..143
ROW_W4 = 144   # fc4 weight zero-padded to (64, 64)    -> rows 144..207
SLAB_ROWS = 208


def _batchnorm(h, gamma, beta):
    # Training-mode BatchNorm1d: biased variance over the batch axis.
    mean = jnp.mean(h, axis=0, keepdims=True)
    var = jnp.mean((h - mean) * (h - mean), axis=0, keepdims=True)
    return (h - mean) * jax.lax.rsqrt(var + BN_EPS) * gamma + beta


def net_kernel(x_ref, p_ref, o_ref):
    x = x_ref[...]                                   # (B, 1)

    w1 = p_ref[pl.ds(ROW_W1, 1), :]                  # (1, 64)
    g = p_ref[pl.ds(ROW_G, 4), :]                    # (4, 64)
    be = p_ref[pl.ds(ROW_BE, 4), :]                  # (4, 64)
    w2 = p_ref[pl.ds(ROW_W2, HID), :]                # (64, 64)
    w3 = p_ref[pl.ds(ROW_W3, HID), :]                # (64, 64)
    w4 = p_ref[pl.ds(ROW_W4, HID), :]                # (64, 64), cols 2..63 zero

    # fc1 (K=1 contraction) as a VPU broadcast multiply; bias dead under BN.
    h = x * w1                                       # (B, 64)
    h = jnp.tanh(_batchnorm(h, g[0:1, :], be[0:1, :]))

    # fc2 -> bn2 -> tanh
    h = jnp.dot(h, w2, preferred_element_type=jnp.float32)
    h = jnp.tanh(_batchnorm(h, g[1:2, :], be[1:2, :]))

    # fc3 -> bn3 -> tanh
    h = jnp.dot(h, w3, preferred_element_type=jnp.float32)
    h = jnp.tanh(_batchnorm(h, g[2:3, :], be[2:3, :]))

    # fc4 (padded to 64 cols) -> bn4 ; padded columns stay exactly 0.
    h = jnp.dot(h, w4, preferred_element_type=jnp.float32)   # (B, 64)
    h = _batchnorm(h, g[3:4, :], be[3:4, :])

    # split -> phi, tau ; tau = tanh(tau)*1.5 ; concat  ==  masked select.
    h2 = h[:, 0:2]                                   # (B, 2)
    col = jax.lax.broadcasted_iota(jnp.int32, h2.shape, 1)
    o_ref[...] = jnp.where(col == 0, h2, 1.5 * jnp.tanh(h2))


def pack_params(p):
    """Pack all parameters into a single (208, 64) f32 slab (see layout above)."""
    f32 = jnp.float32
    w1 = p["w1"].reshape(1, HID).astype(f32)
    pad_w1 = jnp.zeros((7, HID), f32)
    g4 = jnp.concatenate([p["g4"], jnp.ones((1, HID - 2), f32)], axis=1)
    be4 = jnp.concatenate([p["be4"], jnp.zeros((1, HID - 2), f32)], axis=1)
    gammas = jnp.concatenate([p["g1"], p["g2"], p["g3"], g4], axis=0)      # (4, 64)
    betas = jnp.concatenate([p["be1"], p["be2"], p["be3"], be4], axis=0)   # (4, 64)
    w4pad = jnp.concatenate([p["w4"], jnp.zeros((HID, HID - 2), f32)], axis=1)
    slab = jnp.concatenate([w1, pad_w1, gammas, betas,
                            p["w2"], p["w3"], w4pad], axis=0)
    assert slab.shape == (SLAB_ROWS, HID)
    return slab.astype(f32)


def net_forward(x, param_slab):
    """x: (B, 1) float32.  param_slab: (208, 64) float32 packed parameters."""
    B = x.shape[0]
    return pl.pallas_call(
        net_kernel,
        out_shape=jax.ShapeDtypeStruct((B, 2), jnp.float32),
    )(x, param_slab)


def init_params(key):
    """PyTorch-default init: Linear ~ U(+-1/sqrt(fan_in)), BN gamma=1, beta=0."""
    def linear(k, fan_in, fan_out):
        kw, kb = jax.random.split(k)
        bound = 1.0 / jnp.sqrt(jnp.float32(fan_in))
        w = jax.random.uniform(kw, (fan_in, fan_out), jnp.float32, -bound, bound)
        b = jax.random.uniform(kb, (1, fan_out), jnp.float32, -bound, bound)
        return w, b

    k1, k2, k3, k4 = jax.random.split(key, 4)
    w1, b1 = linear(k1, 1, 64)
    w2, b2 = linear(k2, 64, 64)
    w3, b3 = linear(k3, 64, 64)
    w4, b4 = linear(k4, 64, 2)

    def bn(f):
        return jnp.ones((1, f), jnp.float32), jnp.zeros((1, f), jnp.float32)

    g1, be1 = bn(64)
    g2, be2 = bn(64)
    g3, be3 = bn(64)
    g4, be4 = bn(2)

    return dict(w1=w1, b1=b1, g1=g1, be1=be1,
                w2=w2, b2=b2, g2=g2, be2=be2,
                w3=w3, b3=b3, g3=g3, be3=be3,
                w4=w4, b4=b4, g4=g4, be4=be4)


def net_reference(x, p):
    """Pure-JAX reference matching the PyTorch module exactly (biases included)."""
    def bn(h, g, b):
        mean = jnp.mean(h, axis=0, keepdims=True)
        var = jnp.mean((h - mean) ** 2, axis=0, keepdims=True)
        return (h - mean) * jax.lax.rsqrt(var + BN_EPS) * g + b

    h = jnp.tanh(bn(x @ p["w1"] + p["b1"], p["g1"], p["be1"]))
    h = jnp.tanh(bn(h @ p["w2"] + p["b2"], p["g2"], p["be2"]))
    h = jnp.tanh(bn(h @ p["w3"] + p["b3"], p["g3"], p["be3"]))
    h = bn(h @ p["w4"] + p["b4"], p["g4"], p["be4"])
    phi, tau = h[:, 0:1], h[:, 1:2]
    return jnp.concatenate([phi, 1.5 * jnp.tanh(tau)], axis=1)


if __name__ == "__main__":
    key = jax.random.PRNGKey(0)
    pkey, xkey = jax.random.split(key)

    params = init_params(pkey)
    slab = pack_params(params)

    B = 8
    x = jax.random.normal(xkey, (B, 1), jnp.float32)

    out = net_forward(x, slab)
    out = jax.block_until_ready(out)
    assert out.shape == (B, 2) and out.dtype == jnp.float32

    ref = jax.block_until_ready(net_reference(x, params))
    assert jnp.allclose(out, ref, rtol=1e-3, atol=1e-3), (out, ref)

    print("KERNEL_OK")
</pallas_src>

<mosaic_0001>
module attributes {stable_mosaic.version = 11 : i64} {
  func.func @net_kernel(%arg0: memref<8x1xf32, #tpu.memory_space<vmem>>, %arg1: memref<208x64xf32, #tpu.memory_space<vmem>>, %arg2: memref<8x2xf32, #tpu.memory_space<vmem>>) attributes {dimension_semantics = [], scalar_prefetch = 0 : i64, scratch_operands = 0 : i64, tpu.core_type = #tpu.core_type<tc>} {
    %c0 = arith.constant 0 : index
    %c0_0 = arith.constant 0 : index
    %0 = vector.load %arg0[%c0, %c0_0] : memref<8x1xf32, #tpu.memory_space<vmem>>, vector<8x1xf32>
    %c0_1 = arith.constant 0 : index
    %c0_2 = arith.constant 0 : index
    %1 = vector.load %arg1[%c0_1, %c0_2] : memref<208x64xf32, #tpu.memory_space<vmem>>, vector<1x64xf32>
    %c8 = arith.constant 8 : index
    %c0_3 = arith.constant 0 : index
    %2 = vector.load %arg1[%c8, %c0_3] : memref<208x64xf32, #tpu.memory_space<vmem>>, vector<4x64xf32>
    %c12 = arith.constant 12 : index
    %c0_4 = arith.constant 0 : index
    %3 = vector.load %arg1[%c12, %c0_4] : memref<208x64xf32, #tpu.memory_space<vmem>>, vector<4x64xf32>
    %c16 = arith.constant 16 : index
    %c0_5 = arith.constant 0 : index
    %4 = vector.load %arg1[%c16, %c0_5] : memref<208x64xf32, #tpu.memory_space<vmem>>, vector<64x64xf32>
    %c80 = arith.constant 80 : index
    %c0_6 = arith.constant 0 : index
    %5 = vector.load %arg1[%c80, %c0_6] : memref<208x64xf32, #tpu.memory_space<vmem>>, vector<64x64xf32>
    %c144 = arith.constant 144 : index
    %c0_7 = arith.constant 0 : index
    %6 = vector.load %arg1[%c144, %c0_7] : memref<208x64xf32, #tpu.memory_space<vmem>>, vector<64x64xf32>
    %7 = vector.broadcast %0 : vector<8x1xf32> to vector<8x64xf32>
    %8 = vector.broadcast %1 : vector<1x64xf32> to vector<8x64xf32>
    %9 = arith.mulf %7, %8 : vector<8x64xf32>
    %10 = vector.extract_strided_slice %2 {offsets = [0, 0], sizes = [1, 64], strides = [1, 1]} : vector<4x64xf32> to vector<1x64xf32>
    %11 = vector.extract_strided_slice %3 {offsets = [0, 0], sizes = [1, 64], strides = [1, 1]} : vector<4x64xf32> to vector<1x64xf32>
    %cst = arith.constant dense<0.000000e+00> : vector<64xf32>
    %12 = vector.multi_reduction <add>, %9, %cst [0] : vector<8x64xf32> to vector<64xf32>
    %13 = vector.shape_cast %12 : vector<64xf32> to vector<1x64xf32>
    %cst_8 = arith.constant 8.000000e+00 : f32
    %14 = vector.broadcast %cst_8 : f32 to vector<1x64xf32>
    %15 = arith.divf %13, %14 : vector<1x64xf32>
    %16 = vector.broadcast %15 : vector<1x64xf32> to vector<8x64xf32>
    %17 = arith.subf %9, %16 : vector<8x64xf32>
    %18 = vector.broadcast %15 : vector<1x64xf32> to vector<8x64xf32>
    %19 = arith.subf %9, %18 : vector<8x64xf32>
    %20 = arith.mulf %17, %19 : vector<8x64xf32>
    %cst_9 = arith.constant dense<0.000000e+00> : vector<64xf32>
    %21 = vector.multi_reduction <add>, %20, %cst_9 [0] : vector<8x64xf32> to vector<64xf32>
    %22 = vector.shape_cast %21 : vector<64xf32> to vector<1x64xf32>
    %cst_10 = arith.constant 8.000000e+00 : f32
    %23 = vector.broadcast %cst_10 : f32 to vector<1x64xf32>
    %24 = arith.divf %22, %23 : vector<1x64xf32>
    %25 = vector.broadcast %15 : vector<1x64xf32> to vector<8x64xf32>
    %26 = arith.subf %9, %25 : vector<8x64xf32>
    %cst_11 = arith.constant 9.99999974E-6 : f32
    %27 = vector.broadcast %cst_11 : f32 to vector<1x64xf32>
    %28 = arith.addf %24, %27 : vector<1x64xf32>
    %29 = math.rsqrt %28 : vector<1x64xf32>
    %30 = vector.broadcast %29 : vector<1x64xf32> to vector<8x64xf32>
    %31 = arith.mulf %26, %30 : vector<8x64xf32>
    %32 = vector.broadcast %10 : vector<1x64xf32> to vector<8x64xf32>
    %33 = arith.mulf %31, %32 : vector<8x64xf32>
    %34 = vector.broadcast %11 : vector<1x64xf32> to vector<8x64xf32>
    %35 = arith.addf %33, %34 : vector<8x64xf32>
    %36 = math.tanh %35 : vector<8x64xf32>
    %cst_12 = arith.constant dense<0.000000e+00> : vector<8x64xf32>
    %37 = tpu.matmul %36, %4, %cst_12 {dimension_numbers = #tpu.dot_dimension_numbers<[1], [0], [0], [1], [0, 0, 1, 1], [], []>} : vector<8x64xf32>, vector<64x64xf32>, vector<8x64xf32> -> vector<8x64xf32>
    %38 = vector.extract_strided_slice %2 {offsets = [1, 0], sizes = [1, 64], strides = [1, 1]} : vector<4x64xf32> to vector<1x64xf32>
    %39 = vector.extract_strided_slice %3 {offsets = [1, 0], sizes = [1, 64], strides = [1, 1]} : vector<4x64xf32> to vector<1x64xf32>
    %cst_13 = arith.constant dense<0.000000e+00> : vector<64xf32>
    %40 = vector.multi_reduction <add>, %37, %cst_13 [0] : vector<8x64xf32> to vector<64xf32>
    %41 = vector.shape_cast %40 : vector<64xf32> to vector<1x64xf32>
    %cst_14 = arith.constant 8.000000e+00 : f32
    %42 = vector.broadcast %cst_14 : f32 to vector<1x64xf32>
    %43 = arith.divf %41, %42 : vector<1x64xf32>
    %44 = vector.broadcast %43 : vector<1x64xf32> to vector<8x64xf32>
    %45 = arith.subf %37, %44 : vector<8x64xf32>
    %46 = vector.broadcast %43 : vector<1x64xf32> to vector<8x64xf32>
    %47 = arith.subf %37, %46 : vector<8x64xf32>
    %48 = arith.mulf %45, %47 : vector<8x64xf32>
    %cst_15 = arith.constant dense<0.000000e+00> : vector<64xf32>
    %49 = vector.multi_reduction <add>, %48, %cst_15 [0] : vector<8x64xf32> to vector<64xf32>
    %50 = vector.shape_cast %49 : vector<64xf32> to vector<1x64xf32>
    %cst_16 = arith.constant 8.000000e+00 : f32
    %51 = vector.broadcast %cst_16 : f32 to vector<1x64xf32>
    %52 = arith.divf %50, %51 : vector<1x64xf32>
    %53 = vector.broadcast %43 : vector<1x64xf32> to vector<8x64xf32>
    %54 = arith.subf %37, %53 : vector<8x64xf32>
    %cst_17 = arith.constant 9.99999974E-6 : f32
    %55 = vector.broadcast %cst_17 : f32 to vector<1x64xf32>
    %56 = arith.addf %52, %55 : vector<1x64xf32>
    %57 = math.rsqrt %56 : vector<1x64xf32>
    %58 = vector.broadcast %57 : vector<1x64xf32> to vector<8x64xf32>
    %59 = arith.mulf %54, %58 : vector<8x64xf32>
    %60 = vector.broadcast %38 : vector<1x64xf32> to vector<8x64xf32>
    %61 = arith.mulf %59, %60 : vector<8x64xf32>
    %62 = vector.broadcast %39 : vector<1x64xf32> to vector<8x64xf32>
    %63 = arith.addf %61, %62 : vector<8x64xf32>
    %64 = math.tanh %63 : vector<8x64xf32>
    %cst_18 = arith.constant dense<0.000000e+00> : vector<8x64xf32>
    %65 = tpu.matmul %64, %5, %cst_18 {dimension_numbers = #tpu.dot_dimension_numbers<[1], [0], [0], [1], [0, 0, 1, 1], [], []>} : vector<8x64xf32>, vector<64x64xf32>, vector<8x64xf32> -> vector<8x64xf32>
    %66 = vector.extract_strided_slice %2 {offsets = [2, 0], sizes = [1, 64], strides = [1, 1]} : vector<4x64xf32> to vector<1x64xf32>
    %67 = vector.extract_strided_slice %3 {offsets = [2, 0], sizes = [1, 64], strides = [1, 1]} : vector<4x64xf32> to vector<1x64xf32>
    %cst_19 = arith.constant dense<0.000000e+00> : vector<64xf32>
    %68 = vector.multi_reduction <add>, %65, %cst_19 [0] : vector<8x64xf32> to vector<64xf32>
    %69 = vector.shape_cast %68 : vector<64xf32> to vector<1x64xf32>
    %cst_20 = arith.constant 8.000000e+00 : f32
    %70 = vector.broadcast %cst_20 : f32 to vector<1x64xf32>
    %71 = arith.divf %69, %70 : vector<1x64xf32>
    %72 = vector.broadcast %71 : vector<1x64xf32> to vector<8x64xf32>
    %73 = arith.subf %65, %72 : vector<8x64xf32>
    %74 = vector.broadcast %71 : vector<1x64xf32> to vector<8x64xf32>
    %75 = arith.subf %65, %74 : vector<8x64xf32>
    %76 = arith.mulf %73, %75 : vector<8x64xf32>
    %cst_21 = arith.constant dense<0.000000e+00> : vector<64xf32>
    %77 = vector.multi_reduction <add>, %76, %cst_21 [0] : vector<8x64xf32> to vector<64xf32>
    %78 = vector.shape_cast %77 : vector<64xf32> to vector<1x64xf32>
    %cst_22 = arith.constant 8.000000e+00 : f32
    %79 = vector.broadcast %cst_22 : f32 to vector<1x64xf32>
    %80 = arith.divf %78, %79 : vector<1x64xf32>
    %81 = vector.broadcast %71 : vector<1x64xf32> to vector<8x64xf32>
    %82 = arith.subf %65, %81 : vector<8x64xf32>
    %cst_23 = arith.constant 9.99999974E-6 : f32
    %83 = vector.broadcast %cst_23 : f32 to vector<1x64xf32>
    %84 = arith.addf %80, %83 : vector<1x64xf32>
    %85 = math.rsqrt %84 : vector<1x64xf32>
    %86 = vector.broadcast %85 : vector<1x64xf32> to vector<8x64xf32>
    %87 = arith.mulf %82, %86 : vector<8x64xf32>
    %88 = vector.broadcast %66 : vector<1x64xf32> to vector<8x64xf32>
    %89 = arith.mulf %87, %88 : vector<8x64xf32>
    %90 = vector.broadcast %67 : vector<1x64xf32> to vector<8x64xf32>
    %91 = arith.addf %89, %90 : vector<8x64xf32>
    %92 = math.tanh %91 : vector<8x64xf32>
    %cst_24 = arith.constant dense<0.000000e+00> : vector<8x64xf32>
    %93 = tpu.matmul %92, %6, %cst_24 {dimension_numbers = #tpu.dot_dimension_numbers<[1], [0], [0], [1], [0, 0, 1, 1], [], []>} : vector<8x64xf32>, vector<64x64xf32>, vector<8x64xf32> -> vector<8x64xf32>
    %94 = vector.extract_strided_slice %2 {offsets = [3, 0], sizes = [1, 64], strides = [1, 1]} : vector<4x64xf32> to vector<1x64xf32>
    %95 = vector.extract_strided_slice %3 {offsets = [3, 0], sizes = [1, 64], strides = [1, 1]} : vector<4x64xf32> to vector<1x64xf32>
    %cst_25 = arith.constant dense<0.000000e+00> : vector<64xf32>
    %96 = vector.multi_reduction <add>, %93, %cst_25 [0] : vector<8x64xf32> to vector<64xf32>
    %97 = vector.shape_cast %96 : vector<64xf32> to vector<1x64xf32>
    %cst_26 = arith.constant 8.000000e+00 : f32
    %98 = vector.broadcast %cst_26 : f32 to vector<1x64xf32>
    %99 = arith.divf %97, %98 : vector<1x64xf32>
    %100 = vector.broadcast %99 : vector<1x64xf32> to vector<8x64xf32>
    %101 = arith.subf %93, %100 : vector<8x64xf32>
    %102 = vector.broadcast %99 : vector<1x64xf32> to vector<8x64xf32>
    %103 = arith.subf %93, %102 : vector<8x64xf32>
    %104 = arith.mulf %101, %103 : vector<8x64xf32>
    %cst_27 = arith.constant dense<0.000000e+00> : vector<64xf32>
    %105 = vector.multi_reduction <add>, %104, %cst_27 [0] : vector<8x64xf32> to vector<64xf32>
    %106 = vector.shape_cast %105 : vector<64xf32> to vector<1x64xf32>
    %cst_28 = arith.constant 8.000000e+00 : f32
    %107 = vector.broadcast %cst_28 : f32 to vector<1x64xf32>
    %108 = arith.divf %106, %107 : vector<1x64xf32>
    %109 = vector.broadcast %99 : vector<1x64xf32> to vector<8x64xf32>
    %110 = arith.subf %93, %109 : vector<8x64xf32>
    %cst_29 = arith.constant 9.99999974E-6 : f32
    %111 = vector.broadcast %cst_29 : f32 to vector<1x64xf32>
    %112 = arith.addf %108, %111 : vector<1x64xf32>
    %113 = math.rsqrt %112 : vector<1x64xf32>
    %114 = vector.broadcast %113 : vector<1x64xf32> to vector<8x64xf32>
    %115 = arith.mulf %110, %114 : vector<8x64xf32>
    %116 = vector.broadcast %94 : vector<1x64xf32> to vector<8x64xf32>
    %117 = arith.mulf %115, %116 : vector<8x64xf32>
    %118 = vector.broadcast %95 : vector<1x64xf32> to vector<8x64xf32>
    %119 = arith.addf %117, %118 : vector<8x64xf32>
    %120 = vector.extract_strided_slice %119 {offsets = [0, 0], sizes = [8, 2], strides = [1, 1]} : vector<8x64xf32> to vector<8x2xf32>
    %121 = tpu.iota {dimensions = array<i32: 1>} : vector<8x2xi32>
    %c0_i32 = arith.constant 0 : i32
    %122 = vector.broadcast %c0_i32 : i32 to vector<8x2xi32>
    %123 = arith.cmpi eq, %121, %122 : vector<8x2xi32>
    %124 = math.tanh %120 : vector<8x2xf32>
    %cst_30 = arith.constant 1.500000e+00 : f32
    %125 = vector.broadcast %cst_30 : f32 to vector<8x2xf32>
    %126 = arith.mulf %125, %124 : vector<8x2xf32>
    %127 = arith.select %123, %120, %126 : vector<8x2xi1>, vector<8x2xf32>
    %c0_31 = arith.constant 0 : index
    %c0_32 = arith.constant 0 : index
    %128 = vector.load %arg2[%c0_31, %c0_32] : memref<8x2xf32, #tpu.memory_space<vmem>>, vector<8x2xf32>
    tpu.vector_store %arg2[%c0_31, %c0_32], %127 {strides = array<i32>} : memref<8x2xf32, #tpu.memory_space<vmem>>, vector<8x2xf32>,
    return
  }
}

</mosaic_0001>

<bundles_post_ra>
// kernel: tpu_custom_call.1
= control target key start
LH: loop header
LB: loop body
LE: loop exit
PB: predicated region body
PF: predicated region fallthrough
CT: control target
= control target key end

     0   :  { %v554_v0 = vmov 0   ;;  %v555_v5 = vmov 0.0|0.0   ;;  %vm556_vm0 = vmmov 0   ;;  %v557_v14 = vmov 0.0   ;;  %s706_s0 = inlined_call_operand.vmem [shape: f32[8,1], index: 0, kind: input, shape index: {}]   ;;  %s707_s1 = inlined_call_operand.vmem [shape: f32[208,64], index: 1, kind: input, shape index: {}]   ;;  %s708_s2 = inlined_call_operand.vmem [shape: f32[8,2], index: 2, kind: output, shape index: {}]  }
   0x1   :  { %537 = vset.pattern.permute.xlu0 %v554_v0  ;;  %v11_v1 = vld [vmem:[%s706_s0] sm:$0xff]  ;;  %v15_v2 = vld [vmem:[%s707_s1 + $0x10] sm:$0xff]  ;;  %v16_v3 = vld [vmem:[%s707_s1 + $0x18] sm:$0xff]  ;;  %497 = vmatprep.subr.bf16.mxu0 %v555_v5  ;;  %vm49_vm1 = vcmask 523264   ;;  %v72_v37 = vlaneseq  ;;  %vm403_vm3 = vcmask 15360  }
   0x2   :  { %41 = vperm.xlu0 %537, %v11_v1   ;;  %v498_v4 = vpack.c.bf16 %v16_v3, %v15_v2  ;;  %509 = vmatprep.subr.bf16.mxu1 %v555_v5  ;;  %v17_v6 = vld [vmem:[%s707_s1 + $0x20] sm:$0xff]  ;;  %v18_v7 = vld [vmem:[%s707_s1 + $0x28] sm:$0xff]  ;;  %v19_v9 = vld [vmem:[%s707_s1 + $0x30] sm:$0xff] }
   0x3   :  { %v501_v8 = vpack.c.bf16 %v18_v7, %v17_v6  ;;  %v20_v10 = vld [vmem:[%s707_s1 + $0x38] sm:$0xff]  ;;  %v21_v12 = vld [vmem:[%s707_s1 + $0x40] sm:$0xff]  ;;  %v22_v13 = vld [vmem:[%s707_s1 + $0x48] sm:$0xff]  ;;  %456 = vmatprep.mubr.msk.f32.mxu0 %vm556_vm0, %v557_v14  ;;  %475 = vmatprep.mubr.msk.f32.mxu1 %vm556_vm0, %v557_v14  ;;  %v614_v39 = vshrl.u32 %v72_v37, 7 }
   0x4   :  { %499 = vmatpush3.bf16.msra.mxu0 %v498_v4  ;;  %v504_v11 = vpack.c.bf16 %v20_v10, %v19_v9  ;;  %v507_v15 = vpack.c.bf16 %v22_v13, %v21_v12  ;;  %v409_v16 = vld [vmem:[%s707_s1] ss:$0 sm:$0xff]  ;;  %v620_v41 = vld [vmem:[%s707_s1 + $0x8] sm:$0xf]  ;;  %v625_v42 = vld [vmem:[%s707_s1 + $0xc] sm:$0xf] }
   0x5   :  { %500 = vmatprep.subr.bf16.mxu0 %v555_v5  ;;  %v74_v40 = vsub.s32 0, %v614_v39  ;;  %v23_v50 = vld [vmem:[%s707_s1 + $0x50] sm:$0xff]  ;;  %v24_v51 = vld [vmem:[%s707_s1 + $0x58] sm:$0xff]  ;;  %v25_v53 = vld [vmem:[%s707_s1 + $0x60] sm:$0xff] }
   0x6   :  { %v510_v52 = vpack.c.bf16 %v24_v51, %v23_v50  ;;  %v26_v54 = vld [vmem:[%s707_s1 + $0x68] sm:$0xff]  ;;  %v27_v56 = vld [vmem:[%s707_s1 + $0x70] sm:$0xff]  ;;  %v28_v57 = vld [vmem:[%s707_s1 + $0x78] sm:$0xff] }
   0x7   :  { %v75_v43 = vrot.slane %v620_v41, %v74_v40  ;;  %v80_v45 = vrot.slane %v625_v42, %v74_v40  ;;  %v513_v55 = vpack.c.bf16 %v26_v54, %v25_v53  ;;  %v516_v58 = vpack.c.bf16 %v28_v57, %v27_v56  ;;  %v29_v59 = vld [vmem:[%s707_s1 + $0x80] sm:$0xff]  ;;  %v30_v60 = vld [vmem:[%s707_s1 + $0x88] sm:$0xff] }
   0x8   :  { %502 = vmatpush3.bf16.msra.mxu0 %v501_v8  ;;  %511 = vmatpush3.bf16.msra.mxu1 %v510_v52  ;;  %v519_v61 = vpack.c.bf16 %v30_v60, %v29_v59  ;;  %v38_v40 = vld [vmem:[%s707_s1 + $0xc8] sm:$0xff] }
   0x9   :  { %503 = vmatprep.subr.bf16.mxu0 %v555_v5  ;;  %512 = vmatprep.subr.bf16.mxu1 %v555_v5 }
   0xc   :  { %505 = vmatpush3.bf16.msra.mxu0 %v504_v11  ;;  %514 = vmatpush3.bf16.msra.mxu1 %v513_v55 }
   0xd   :  { %506 = vmatprep.subr.bf16.mxu0 %v555_v5  ;;  %515 = vmatprep.subr.bf16.mxu1 %v555_v5 }
  0x10   :  { %508 = vmatpush3.bf16.msra.mxu0 %v507_v15  ;;  %517 = vmatpush3.bf16.msra.mxu1 %v516_v58 }
  0x11   :  { %521 = vmatprep.subr.bf16.mxu0 %v555_v5  ;;  %518 = vmatprep.subr.bf16.mxu1 %v555_v5 }
  0x14   :  { %520 = vmatpush3.bf16.msra.mxu1 %v519_v61 }
  0x81   :  { %v42_v17 = vpop.permute.xlu0 %41 }
  0x82   :  { %v48_v18 = vmul.f32 %v409_v16, %v42_v17 }
  0x84   :  { %v50_v19 = vsel %vm49_vm1, %v48_v18, 0.0 }
  0x85   :  { %v51_v20 = vrot.slane %v50_v19, 4 }
  0x87   :  { %v52_v21 = vadd.f32 %v51_v20, %v50_v19  ;;  %v179_v20 = vsub.s32 1, %v614_v39 }
  0x89   :  { %v53_v22 = vrot.slane %v52_v21, 2 }
  0x8b   :  { %v54_v23 = vadd.f32 %v53_v22, %v52_v21  ;;  %v180_v21 = vrot.slane %v620_v41, %v179_v20 }
  0x8d   :  { %v55_v24 = vrot.slane %v54_v23, 1 }
  0x8f   :  { %v56_v25 = vadd.f32 %v55_v24, %v54_v23  ;;  %v185_v24 = vrot.slane %v625_v42, %v179_v20 }
  0x91   :  { %v58_v26 = vmul.f32 0.125, %v56_v25 }
  0x93   :  { %v59_v27 = vsub.f32 %v48_v18, %v58_v26 }
  0x95   :  { %v60_v28 = vmul.f32 %v59_v27, %v59_v27 }
  0x97   :  { %v61_v29 = vsel %vm49_vm1, %v60_v28, 0.0  ;;  %v31_v28 = vld [vmem:[%s707_s1 + $0x90] sm:$0xff] }
  0x98   :  { %v62_v30 = vrot.slane %v61_v29, 4 }
  0x9a   :  { %v63_v31 = vadd.f32 %v62_v30, %v61_v29  ;;  %v32_v29 = vld [vmem:[%s707_s1 + $0x98] sm:$0xff] }
  0x9b   :  { %v522_v30 = vpack.c.bf16 %v32_v29, %v31_v28 }
  0x9c   :  { %v64_v32 = vrot.slane %v63_v31, 2 }
  0x9e   :  { %v65_v33 = vadd.f32 %v64_v32, %v63_v31  ;;  %v33_v31 = vld [vmem:[%s707_s1 + $0xa0] sm:$0xff]  ;;  %v34_v32 = vld [vmem:[%s707_s1 + $0xa8] sm:$0xff] }
  0xa0   :  { %v66_v34 = vrot.slane %v65_v33, 1 }
  0xa2   :  { %v67_v35 = vadd.f32 %v66_v34, %v65_v33  ;;  %v525_v33 = vpack.c.bf16 %v34_v32, %v33_v31  ;;  %v35_v34 = vld [vmem:[%s707_s1 + $0xb0] sm:$0xff] }
  0xa4   :  { %v68_v36 = vmul.f32 0.125, %v67_v35  ;;  %v36_v35 = vld [vmem:[%s707_s1 + $0xb8] sm:$0xff] }
  0xa6   :  { %v69_v38 = vadd.f32 1e-05, %v68_v36  ;;  %v528_v36 = vpack.c.bf16 %v36_v35, %v35_v34 }
  0xa8   :  { %538 = vrsqrt.f32 %v69_v38  ;;  %v37_v38 = vld [vmem:[%s707_s1 + $0xc0] sm:$0xff] }
  0xb2   :  { %v539_v44 = vpop.eup %538 }
  0xb3   :  { %v71_v46 = vmul.f32 %v539_v44, %v59_v27 }
  0xb5   :  { %v76_v47 = vmul.f32 %v75_v43, %v71_v46  ;;  %v531_v43 = vpack.c.bf16 %v38_v40, %v37_v38  ;;  %v398_v38 = vand.u32 127, %v72_v37 }
  0xb7   :  { %v81_v48 = vadd.f32 %v80_v45, %v76_v47  ;;  %vm399_vm2 = vcmp.eq.s32.totalorder %v398_v38, 0 }
  0xb9   :  { %540 = vtanh.f32 %v81_v48 }
  0xc3   :  { %v541_v49 = vpop.eup %540 }
  0xc4   :  { %457 = vmatmul.mubr.msk.f32.vlgmr.msra.gmra.mrb[0].mxu0 %vm49_vm1, %v541_v49 }
  0xc5   :  { %494 = vmatprep.mubr.msk.f32.mxu0 %vm556_vm0, %v557_v14  ;;  %523 = vmatpush3.bf16.msra.mxu0 %v522_v30  ;;  %v389_v30 = vsub.s32 3, %v614_v39 }
  0xc6   :  { %524 = vmatprep.subr.bf16.mxu0 %v555_v5 }
  0xc7   :  { %v390_v31 = vrot.slane %v620_v41, %v389_v30  ;;  %v395_v34 = vrot.slane %v625_v42, %v389_v30 }
  0xc9   :  { %526 = vmatpush3.bf16.msra.mxu0 %v525_v33 }
  0xca   :  { %527 = vmatprep.subr.bf16.mxu0 %v555_v5 }
  0xcd   :  { %529 = vmatpush3.bf16.msra.mxu0 %v528_v36 }
  0xce   :  { %530 = vmatprep.subr.bf16.mxu0 %v555_v5 }
  0xd1   :  { %532 = vmatpush3.bf16.msra.mxu0 %v531_v43 }
 0x197   :  { %v152_v62 = vpop.f32.mrb[0].mxu0 }
 0x198   :  { %v156_v63 = vsel %vm49_vm1, %v152_v62, 0.0  ;;  %v458_v0 = vpop.f32.mrb[1].mxu0 }
 0x199   :  { %v157_v1 = vrot.slane %v156_v63, 4  ;;  %v284_v0 = vsub.s32 2, %v614_v39 }
 0x19b   :  { %v158_v2 = vadd.f32 %v157_v1, %v156_v63  ;;  %v285_v1 = vrot.slane %v620_v41, %v284_v0 }
 0x19d   :  { %v159_v3 = vrot.slane %v158_v2, 2 }
 0x19f   :  { %v160_v4 = vadd.f32 %v159_v3, %v158_v2 }
 0x1a1   :  { %v161_v6 = vrot.slane %v160_v4, 1 }
 0x1a3   :  { %v162_v7 = vadd.f32 %v161_v6, %v160_v4  ;;  %v290_v4 = vrot.slane %v625_v42, %v284_v0 }
 0x1a5   :  { %v163_v8 = vmul.f32 0.125, %v162_v7 }
 0x1a7   :  { %v164_v9 = vsub.f32 %v152_v62, %v163_v8 }
 0x1a9   :  { %v165_v10 = vmul.f32 %v164_v9, %v164_v9 }
 0x1ab   :  { %v166_v11 = vsel %vm49_vm1, %v165_v10, 0.0 }
 0x1ac   :  { %v167_v12 = vrot.slane %v166_v11, 4 }
 0x1ae   :  { %v168_v13 = vadd.f32 %v167_v12, %v166_v11 }
 0x1b0   :  { %v169_v14 = vrot.slane %v168_v13, 2 }
 0x1b2   :  { %v170_v15 = vadd.f32 %v169_v14, %v168_v13 }
 0x1b4   :  { %v171_v16 = vrot.slane %v170_v15, 1 }
 0x1b6   :  { %v172_v17 = vadd.f32 %v171_v16, %v170_v15 }
 0x1b8   :  { %v173_v18 = vmul.f32 0.125, %v172_v17 }
 0x1ba   :  { %v174_v19 = vadd.f32 1e-05, %v173_v18 }
 0x1bc   :  { %542 = vrsqrt.f32 %v174_v19 }
 0x1c6   :  { %v543_v22 = vpop.eup %542 }
 0x1c7   :  { %v176_v23 = vmul.f32 %v543_v22, %v164_v9 }
 0x1c9   :  { %v181_v25 = vmul.f32 %v180_v21, %v176_v23 }
 0x1cb   :  { %v186_v26 = vadd.f32 %v185_v24, %v181_v25 }
 0x1cd   :  { %544 = vtanh.f32 %v186_v26 }
 0x1d7   :  { %v545_v27 = vpop.eup %544 }
 0x1d8   :  { %476 = vmatmul.mubr.msk.f32.vlgmr.msra.gmra.mrb[0].mxu1 %vm49_vm1, %v545_v27 }
 0x2ab   :  { %v257_v44 = vpop.f32.mrb[0].mxu1 }
 0x2ac   :  { %v261_v45 = vsel %vm49_vm1, %v257_v44, 0.0  ;;  %v477_v46 = vpop.f32.mrb[1].mxu1 }
 0x2ad   :  { %v262_v47 = vrot.slane %v261_v45, 4 }
 0x2af   :  { %v263_v48 = vadd.f32 %v262_v47, %v261_v45 }
 0x2b1   :  { %v264_v49 = vrot.slane %v263_v48, 2 }
 0x2b3   :  { %v265_v50 = vadd.f32 %v264_v49, %v263_v48 }
 0x2b5   :  { %v266_v51 = vrot.slane %v265_v50, 1 }
 0x2b7   :  { %v267_v52 = vadd.f32 %v266_v51, %v265_v50 }
 0x2b9   :  { %v268_v53 = vmul.f32 0.125, %v267_v52 }
 0x2bb   :  { %v269_v54 = vsub.f32 %v257_v44, %v268_v53 }
 0x2bd   :  { %v270_v55 = vmul.f32 %v269_v54, %v269_v54 }
 0x2bf   :  { %v271_v56 = vsel %vm49_vm1, %v270_v55, 0.0 }
 0x2c0   :  { %v272_v57 = vrot.slane %v271_v56, 4 }
 0x2c2   :  { %v273_v58 = vadd.f32 %v272_v57, %v271_v56 }
 0x2c4   :  { %v274_v59 = vrot.slane %v273_v58, 2 }
 0x2c6   :  { %v275_v5 = vadd.f32 %v274_v59, %v273_v58 }
 0x2c8   :  { %v276_v60 = vrot.slane %v275_v5, 1 }
 0x2ca   :  { %v277_v61 = vadd.f32 %v276_v60, %v275_v5 }
 0x2cc   :  { %v278_v62 = vmul.f32 0.125, %v277_v61 }
 0x2ce   :  { %v279_v63 = vadd.f32 1e-05, %v278_v62 }
 0x2d0   :  { %546 = vrsqrt.f32 %v279_v63 }
 0x2da   :  { %v547_v2 = vpop.eup %546 }
 0x2db   :  { %v281_v3 = vmul.f32 %v547_v2, %v269_v54 }
 0x2dd   :  { %v286_v6 = vmul.f32 %v285_v1, %v281_v3 }
 0x2df   :  { %v291_v7 = vadd.f32 %v290_v4, %v286_v6 }
 0x2e1   :  { %548 = vtanh.f32 %v291_v7 }
 0x2eb   :  { %v549_v8 = vpop.eup %548 }
 0x2ec   :  { %495 = vmatmul.mubr.msk.f32.vlgmr.msra.gmra.mrb[2].mxu0 %vm49_vm1, %v549_v8 }
 0x3bf   :  { %v362_v9 = vpop.f32.mrb[2].mxu0 }
 0x3c0   :  { %v366_v10 = vsel %vm49_vm1, %v362_v9, 0.0  ;;  %v496_v11 = vpop.f32.mrb[3].mxu0 }
 0x3c1   :  { %v367_v12 = vrot.slane %v366_v10, 4 }
 0x3c3   :  { %v368_v13 = vadd.f32 %v367_v12, %v366_v10 }
 0x3c5   :  { %v369_v14 = vrot.slane %v368_v13, 2 }
 0x3c7   :  { %v370_v15 = vadd.f32 %v369_v14, %v368_v13 }
 0x3c9   :  { %v371_v16 = vrot.slane %v370_v15, 1 }
 0x3cb   :  { %v372_v17 = vadd.f32 %v371_v16, %v370_v15 }
 0x3cd   :  { %v373_v18 = vmul.f32 0.125, %v372_v17 }
 0x3cf   :  { %v374_v19 = vsub.f32 %v362_v9, %v373_v18 }
 0x3d1   :  { %v375_v20 = vmul.f32 %v374_v19, %v374_v19 }
 0x3d3   :  { %v376_v21 = vsel %vm49_vm1, %v375_v20, 0.0 }
 0x3d4   :  { %v377_v22 = vrot.slane %v376_v21, 4 }
 0x3d6   :  { %v378_v23 = vadd.f32 %v377_v22, %v376_v21 }
 0x3d8   :  { %v379_v24 = vrot.slane %v378_v23, 2 }
 0x3da   :  { %v380_v25 = vadd.f32 %v379_v24, %v378_v23 }
 0x3dc   :  { %v381_v26 = vrot.slane %v380_v25, 1 }
 0x3de   :  { %v382_v27 = vadd.f32 %v381_v26, %v380_v25 }
 0x3e0   :  { %v383_v28 = vmul.f32 0.125, %v382_v27 }
 0x3e2   :  { %v384_v29 = vadd.f32 1e-05, %v383_v28 }
 0x3e4   :  { %550 = vrsqrt.f32 %v384_v29 }
 0x3ee   :  { %v551_v32 = vpop.eup %550 }
 0x3ef   :  { %v386_v33 = vmul.f32 %v551_v32, %v374_v19 }
 0x3f1   :  { %v391_v35 = vmul.f32 %v390_v31, %v386_v33 }
 0x3f3   :  { %v396_v36 = vadd.f32 %v395_v34, %v391_v35 }
 0x3f5   :  { %552 = vtanh.f32 %v396_v36 }
 0x3ff   :  { %v553_v40 = vpop.eup %552 }
 0x400   :  { %v401_v43 = vmul.f32 1.5, %v553_v40 }
 0x402   :  { %v402_v44 = vsel %vm399_vm2, %v396_v36, %v401_v43 }
 0x403   :  { %404 = vst.msk [vmem:[%s708_s2] sm:$0xff] %vm403_vm3, %v402_v44 }

</bundles_post_ra>
